<compile_context>
chip_gen: v7x
topology: tpu7x:2x2x1
jax: 0.10.0
libtpu: 0.0.40
codegen_flags: <defaults>
</compile_context>

<pallas_src>
import functools

import jax
import jax.numpy as jnp
from jax.experimental import pallas as pl
from jax.experimental.pallas import tpu as pltpu


def _lstm_recurrent_kernel(emb_ref, wih_ref, whh_ref, b_ref, h0_ref, c0_ref,
                           hall_ref, hn_ref, cn_ref, gx_sc):
    """Single invocation: batched input projection + serial LSTM recurrence."""
    B, H = h0_ref.shape
    SB = emb_ref.shape[0]
    S = SB // B

    # ---- Hoisted input projection: one big MXU matmul for every time step ----
    # (S*B, E) bf16 @ (E, 4H) bf16 -> f32, plus pre-summed bias (b_ih + b_hh).
    gx_sc[...] = (
        jnp.dot(emb_ref[...], wih_ref[...], preferred_element_type=jnp.float32)
        + b_ref[...]
    )

    # State is carried directly in the (VMEM-resident, constant-block) final
    # state outputs; no separate scratch and no redundant copies.
    hn_ref[...] = h0_ref[...]
    cn_ref[...] = c0_ref[...]

    def _sigmoid(x):
        # sigmoid(x) = 0.5 * tanh(0.5 * x) + 0.5  -> one EUP push per vreg
        # instead of the exp + reciprocal lowering.
        return 0.5 * jnp.tanh(0.5 * x) + 0.5

    @pl.loop(0, S)
    def _(t):
        row = pl.multiple_of(t * B, B)
        h_prev = hn_ref[...]                      # (B, H) f32
        c_prev = cn_ref[...]                      # (B, H) f32

        # Only the recurrence-dependent matmul stays on the serial path.
        gates = gx_sc[pl.ds(row, B), :] + jnp.dot(
            h_prev.astype(jnp.bfloat16), whh_ref[...],
            preferred_element_type=jnp.float32)   # (B, 4H), order [i, f, g, o]

        i_g = _sigmoid(gates[:, 0 * H:1 * H])
        f_g = _sigmoid(gates[:, 1 * H:2 * H])
        g_g = jnp.tanh(gates[:, 2 * H:3 * H])
        o_g = _sigmoid(gates[:, 3 * H:4 * H])

        c_new = f_g * c_prev + i_g * g_g
        h_new = o_g * jnp.tanh(c_new)

        hn_ref[...] = h_new
        cn_ref[...] = c_new
        hall_ref[pl.ds(row, B), :] = h_new.astype(hall_ref.dtype)


def _fc_kernel(h_ref, w_ref, b_ref, out_ref):
    """Fused Linear head: (S*B, H) @ (H, TN) tile of the vocab dimension."""
    out_ref[...] = (
        jnp.dot(h_ref[...].astype(jnp.bfloat16), w_ref[...],
                preferred_element_type=jnp.float32)
        + b_ref[...]
    ).astype(out_ref.dtype)


def lm_lstm_forward(x, prev_state, params):
    """x: (S, B) int32 tokens.  prev_state: (h0, c0), each (1, B, H).

    Returns (probs, (h_n, c_n)) with probs: (S, B, V) raw fc logits (matching
    the PyTorch module, which applies no softmax), states (1, B, H).
    """
    emb_table, w_ih, w_hh, b_ih, b_hh, w_fc, b_fc = params
    S, B = x.shape
    E = emb_table.shape[1]
    H = w_hh.shape[1]            # w_hh: (4H, H)
    V = w_fc.shape[0]            # w_fc: (V, H)
    SB = S * B

    # --- glue: embedding gather + weight layout / dtype prep ---
    # TODO(synk): the embedding gather (dynamic row lookup) is left to plain
    # JAX; a Pallas version would need per-row DMA gather and is not worth it
    # at these sizes.
    embedded = jnp.take(emb_table, x, axis=0)                  # (S, B, E) f32
    emb2d = embedded.reshape(SB, E).astype(jnp.bfloat16)       # (S*B, E)
    wih_t = w_ih.T.astype(jnp.bfloat16)                        # (E, 4H)
    whh_t = w_hh.T.astype(jnp.bfloat16)                        # (H, 4H)
    bias = (b_ih + b_hh).reshape(1, 4 * H)                     # (1, 4H) f32
    wfc_t = w_fc.T.astype(jnp.bfloat16)                        # (H, V)
    bfc = b_fc.reshape(1, V)                                   # (1, V)  f32
    h0 = prev_state[0][0]                                      # (B, H)
    c0 = prev_state[1][0]                                      # (B, H)

    # ---- Kernel 1: recurrence (single invocation, in-kernel time loop) ----
    h_all, h_n, c_n = pl.pallas_call(
        _lstm_recurrent_kernel,
        out_shape=(
            jax.ShapeDtypeStruct((SB, H), jnp.float32),   # all hidden states
            jax.ShapeDtypeStruct((B, H), jnp.float32),    # h_n
            jax.ShapeDtypeStruct((B, H), jnp.float32),    # c_n
        ),
        scratch_shapes=[
            pltpu.VMEM((SB, 4 * H), jnp.float32),         # staged gates_x
        ],
    )(emb2d, wih_t, whh_t, bias, h0, c0)

    # ---- Kernel 2: fc head, tiled over the vocab dim, parallel grid ----
    TN = 128 if V % 128 == 0 else V
    logits = pl.pallas_call(
        _fc_kernel,
        out_shape=jax.ShapeDtypeStruct((SB, V), jnp.float32),
        grid=(V // TN,),
        in_specs=[
            pl.BlockSpec((SB, H), lambda j: (0, 0)),      # hidden states (resident)
            pl.BlockSpec((H, TN), lambda j: (0, j)),      # fc weight tile
            pl.BlockSpec((1, TN), lambda j: (0, j)),      # fc bias tile
        ],
        out_specs=pl.BlockSpec((SB, TN), lambda j: (0, j)),
        compiler_params=pltpu.CompilerParams(
            dimension_semantics=("parallel",)),
    )(h_all, wfc_t, bfc)

    probs = logits.reshape(S, B, V)
    return probs, (h_n[None], c_n[None])


def init_params(key, vocab_size, embedding_dim=128, lstm_size=128):
    ks = jax.random.split(key, 7)
    H = lstm_size
    s = 1.0 / jnp.sqrt(H)
    emb_table = jax.random.normal(ks[0], (vocab_size, embedding_dim), jnp.float32)
    w_ih = jax.random.uniform(ks[1], (4 * H, embedding_dim), jnp.float32, -s, s)
    w_hh = jax.random.uniform(ks[2], (4 * H, H), jnp.float32, -s, s)
    b_ih = jax.random.uniform(ks[3], (4 * H,), jnp.float32, -s, s)
    b_hh = jax.random.uniform(ks[4], (4 * H,), jnp.float32, -s, s)
    w_fc = jax.random.uniform(ks[5], (vocab_size, H), jnp.float32, -s, s)
    b_fc = jax.random.uniform(ks[6], (vocab_size,), jnp.float32, -s, s)
    return (emb_table, w_ih, w_hh, b_ih, b_hh, w_fc, b_fc)


if __name__ == "__main__":
    VOCAB, EMB, HID = 256, 128, 128
    SEQ, BATCH = 8, 8

    key = jax.random.PRNGKey(0)
    pkey, xkey = jax.random.split(key)
    params = init_params(pkey, VOCAB, EMB, HID)

    x = jax.random.randint(xkey, (SEQ, BATCH), 0, VOCAB, dtype=jnp.int32)
    h0 = jnp.zeros((1, BATCH, HID), jnp.float32)
    c0 = jnp.zeros((1, BATCH, HID), jnp.float32)

    fwd = jax.jit(functools.partial(lm_lstm_forward, params=params))
    probs, (h_n, c_n) = fwd(x, (h0, c0))
    jax.block_until_ready((probs, h_n, c_n))

    assert probs.shape == (SEQ, BATCH, VOCAB)
    assert h_n.shape == (1, BATCH, HID) and c_n.shape == (1, BATCH, HID)
    print("KERNEL_OK")
</pallas_src>

<mosaic_0001>
module attributes {stable_mosaic.version = 11 : i64} {
  func.func @_lstm_recurrent_kernel(%arg0: memref<64x128xbf16, #tpu.memory_space<vmem>>, %arg1: memref<128x512xbf16, #tpu.memory_space<vmem>>, %arg2: memref<128x512xbf16, #tpu.memory_space<vmem>>, %arg3: memref<1x512xf32, #tpu.memory_space<vmem>>, %arg4: memref<8x128xf32, #tpu.memory_space<vmem>>, %arg5: memref<8x128xf32, #tpu.memory_space<vmem>>, %arg6: memref<64x128xf32, #tpu.memory_space<vmem>>, %arg7: memref<8x128xf32, #tpu.memory_space<vmem>>, %arg8: memref<8x128xf32, #tpu.memory_space<vmem>>, %arg9: memref<64x512xf32, #tpu.memory_space<vmem>>) attributes {dimension_semantics = [], scalar_prefetch = 0 : i64, scratch_operands = 1 : i64, tpu.core_type = #tpu.core_type<tc>} {
    %c0 = arith.constant 0 : index
    %c0_0 = arith.constant 0 : index
    %0 = vector.load %arg0[%c0, %c0_0] : memref<64x128xbf16, #tpu.memory_space<vmem>>, vector<64x128xbf16>
    %c0_1 = arith.constant 0 : index
    %c0_2 = arith.constant 0 : index
    %1 = vector.load %arg1[%c0_1, %c0_2] : memref<128x512xbf16, #tpu.memory_space<vmem>>, vector<128x512xbf16>
    %cst = arith.constant dense<0.000000e+00> : vector<64x512xf32>
    %2 = tpu.matmul %0, %1, %cst {dimension_numbers = #tpu.dot_dimension_numbers<[1], [0], [0], [1], [0, 0, 1, 1], [], []>} : vector<64x128xbf16>, vector<128x512xbf16>, vector<64x512xf32> -> vector<64x512xf32>
    %c0_3 = arith.constant 0 : index
    %c0_4 = arith.constant 0 : index
    %3 = vector.load %arg3[%c0_3, %c0_4] : memref<1x512xf32, #tpu.memory_space<vmem>>, vector<1x512xf32>
    %4 = vector.broadcast %3 : vector<1x512xf32> to vector<64x512xf32>
    %5 = arith.addf %2, %4 : vector<64x512xf32>
    %c0_5 = arith.constant 0 : index
    %c0_6 = arith.constant 0 : index
    %6 = vector.load %arg9[%c0_5, %c0_6] : memref<64x512xf32, #tpu.memory_space<vmem>>, vector<64x512xf32>
    tpu.vector_store %arg9[%c0_5, %c0_6], %5 {strides = array<i32>} : memref<64x512xf32, #tpu.memory_space<vmem>>, vector<64x512xf32>,
    %c0_7 = arith.constant 0 : index
    %c0_8 = arith.constant 0 : index
    %7 = vector.load %arg4[%c0_7, %c0_8] : memref<8x128xf32, #tpu.memory_space<vmem>>, vector<8x128xf32>
    %c0_9 = arith.constant 0 : index
    %c0_10 = arith.constant 0 : index
    %8 = vector.load %arg7[%c0_9, %c0_10] : memref<8x128xf32, #tpu.memory_space<vmem>>, vector<8x128xf32>
    tpu.vector_store %arg7[%c0_9, %c0_10], %7 {strides = array<i32>} : memref<8x128xf32, #tpu.memory_space<vmem>>, vector<8x128xf32>,
    %c0_11 = arith.constant 0 : index
    %c0_12 = arith.constant 0 : index
    %9 = vector.load %arg5[%c0_11, %c0_12] : memref<8x128xf32, #tpu.memory_space<vmem>>, vector<8x128xf32>
    %c0_13 = arith.constant 0 : index
    %c0_14 = arith.constant 0 : index
    %10 = vector.load %arg8[%c0_13, %c0_14] : memref<8x128xf32, #tpu.memory_space<vmem>>, vector<8x128xf32>
    tpu.vector_store %arg8[%c0_13, %c0_14], %9 {strides = array<i32>} : memref<8x128xf32, #tpu.memory_space<vmem>>, vector<8x128xf32>,
    %c0_i32 = arith.constant 0 : i32
    %c8_i32 = arith.constant 8 : i32
    %11 = arith.addi %c0_i32, %c8_i32 : i32
    %c1_i32 = arith.constant 1 : i32
    scf.for %arg10 = %c0_i32 to %11 step %c1_i32  : i32 {
      %c1_i32_16 = arith.constant 1 : i32
      %12 = arith.muli %arg10, %c1_i32_16 : i32
      %c0_i32_17 = arith.constant 0 : i32
      %13 = arith.addi %c0_i32_17, %12 : i32
      %c8_i32_18 = arith.constant 8 : i32
      %14 = arith.muli %13, %c8_i32_18 : i32
      %15 = tpu.assume_multiple %14, 8 : i32
      %c0_19 = arith.constant 0 : index
      %c0_20 = arith.constant 0 : index
      %16 = vector.load %arg7[%c0_19, %c0_20] : memref<8x128xf32, #tpu.memory_space<vmem>>, vector<8x128xf32>
      %c0_21 = arith.constant 0 : index
      %c0_22 = arith.constant 0 : index
      %17 = vector.load %arg8[%c0_21, %c0_22] : memref<8x128xf32, #tpu.memory_space<vmem>>, vector<8x128xf32>
      %18 = arith.index_cast %15 : i32 to index
      %c0_23 = arith.constant 0 : index
      %19 = vector.load %arg9[%18, %c0_23] : memref<64x512xf32, #tpu.memory_space<vmem>>, vector<8x512xf32>
      %20 = arith.truncf %16 : vector<8x128xf32> to vector<8x128xbf16>
      %c0_24 = arith.constant 0 : index
      %c0_25 = arith.constant 0 : index
      %21 = vector.load %arg2[%c0_24, %c0_25] : memref<128x512xbf16, #tpu.memory_space<vmem>>, vector<128x512xbf16>
      %cst_26 = arith.constant dense<0.000000e+00> : vector<8x512xf32>
      %22 = tpu.matmul %20, %21, %cst_26 {dimension_numbers = #tpu.dot_dimension_numbers<[1], [0], [0], [1], [0, 0, 1, 1], [], []>} : vector<8x128xbf16>, vector<128x512xbf16>, vector<8x512xf32> -> vector<8x512xf32>
      %23 = arith.addf %19, %22 : vector<8x512xf32>
      %24 = vector.extract_strided_slice %23 {offsets = [0, 0], sizes = [8, 128], strides = [1, 1]} : vector<8x512xf32> to vector<8x128xf32>
      %cst_27 = arith.constant 5.000000e-01 : f32
      %25 = vector.broadcast %cst_27 : f32 to vector<8x128xf32>
      %26 = arith.mulf %25, %24 : vector<8x128xf32>
      %27 = math.tanh %26 : vector<8x128xf32>
      %cst_28 = arith.constant 5.000000e-01 : f32
      %28 = vector.broadcast %cst_28 : f32 to vector<8x128xf32>
      %29 = arith.mulf %28, %27 : vector<8x128xf32>
      %cst_29 = arith.constant 5.000000e-01 : f32
      %30 = vector.broadcast %cst_29 : f32 to vector<8x128xf32>
      %31 = arith.addf %29, %30 : vector<8x128xf32>
      %32 = vector.extract_strided_slice %23 {offsets = [0, 128], sizes = [8, 128], strides = [1, 1]} : vector<8x512xf32> to vector<8x128xf32>
      %cst_30 = arith.constant 5.000000e-01 : f32
      %33 = vector.broadcast %cst_30 : f32 to vector<8x128xf32>
      %34 = arith.mulf %33, %32 : vector<8x128xf32>
      %35 = math.tanh %34 : vector<8x128xf32>
      %cst_31 = arith.constant 5.000000e-01 : f32
      %36 = vector.broadcast %cst_31 : f32 to vector<8x128xf32>
      %37 = arith.mulf %36, %35 : vector<8x128xf32>
      %cst_32 = arith.constant 5.000000e-01 : f32
      %38 = vector.broadcast %cst_32 : f32 to vector<8x128xf32>
      %39 = arith.addf %37, %38 : vector<8x128xf32>
      %40 = vector.extract_strided_slice %23 {offsets = [0, 256], sizes = [8, 128], strides = [1, 1]} : vector<8x512xf32> to vector<8x128xf32>
      %41 = math.tanh %40 : vector<8x128xf32>
      %42 = vector.extract_strided_slice %23 {offsets = [0, 384], sizes = [8, 128], strides = [1, 1]} : vector<8x512xf32> to vector<8x128xf32>
      %cst_33 = arith.constant 5.000000e-01 : f32
      %43 = vector.broadcast %cst_33 : f32 to vector<8x128xf32>
      %44 = arith.mulf %43, %42 : vector<8x128xf32>
      %45 = math.tanh %44 : vector<8x128xf32>
      %cst_34 = arith.constant 5.000000e-01 : f32
      %46 = vector.broadcast %cst_34 : f32 to vector<8x128xf32>
      %47 = arith.mulf %46, %45 : vector<8x128xf32>
      %cst_35 = arith.constant 5.000000e-01 : f32
      %48 = vector.broadcast %cst_35 : f32 to vector<8x128xf32>
      %49 = arith.addf %47, %48 : vector<8x128xf32>
      %50 = arith.mulf %39, %17 : vector<8x128xf32>
      %51 = arith.mulf %31, %41 : vector<8x128xf32>
      %52 = arith.addf %50, %51 : vector<8x128xf32>
      %53 = math.tanh %52 : vector<8x128xf32>
      %54 = arith.mulf %49, %53 : vector<8x128xf32>
      %c0_36 = arith.constant 0 : index
      %c0_37 = arith.constant 0 : index
      %55 = vector.load %arg7[%c0_36, %c0_37] : memref<8x128xf32, #tpu.memory_space<vmem>>, vector<8x128xf32>
      tpu.vector_store %arg7[%c0_36, %c0_37], %54 {strides = array<i32>} : memref<8x128xf32, #tpu.memory_space<vmem>>, vector<8x128xf32>,
      %c0_38 = arith.constant 0 : index
      %c0_39 = arith.constant 0 : index
      %56 = vector.load %arg8[%c0_38, %c0_39] : memref<8x128xf32, #tpu.memory_space<vmem>>, vector<8x128xf32>
      tpu.vector_store %arg8[%c0_38, %c0_39], %52 {strides = array<i32>} : memref<8x128xf32, #tpu.memory_space<vmem>>, vector<8x128xf32>,
      %57 = arith.index_cast %15 : i32 to index
      %c0_40 = arith.constant 0 : index
      %58 = vector.load %arg6[%57, %c0_40] : memref<64x128xf32, #tpu.memory_space<vmem>>, vector<8x128xf32>
      tpu.vector_store %arg6[%57, %c0_40], %54 {strides = array<i32>} : memref<64x128xf32, #tpu.memory_space<vmem>>, vector<8x128xf32>,
    }
    %c8_i32_15 = arith.constant 8 : i32
    return
  }
}

module attributes {stable_mosaic.version = 11 : i64} {
  func.func @_fc_kernel(%arg0: i32, %arg1: memref<64x128xf32, #tpu.memory_space<vmem>>, %arg2: memref<128x128xbf16, #tpu.memory_space<vmem>>, %arg3: memref<1x128xf32, #tpu.memory_space<vmem>>, %arg4: memref<64x128xf32, #tpu.memory_space<vmem>>) attributes {dimension_semantics = [#tpu.dimension_semantics<parallel>], iteration_bounds = array<i64: 2>, scalar_prefetch = 0 : i64, scratch_operands = 0 : i64, tpu.core_type = #tpu.core_type<tc>, window_params = [{pipeline_mode = #tpu.pipeline_mode<synchronous>, transform_indices = @transform_0, window_bounds = array<i64: 64, 128>}, {transform_indices = @transform_1, window_bounds = array<i64: 128, 128>}, {transform_indices = @transform_2, window_bounds = array<i64: 1, 128>}, {transform_indices = @transform_3, window_bounds = array<i64: 64, 128>}]} {
    %c0 = arith.constant 0 : index
    %c0_0 = arith.constant 0 : index
    %0 = vector.load %arg1[%c0, %c0_0] : memref<64x128xf32, #tpu.memory_space<vmem>>, vector<64x128xf32>
    %1 = arith.truncf %0 : vector<64x128xf32> to vector<64x128xbf16>
    %c0_1 = arith.constant 0 : index
    %c0_2 = arith.constant 0 : index
    %2 = vector.load %arg2[%c0_1, %c0_2] : memref<128x128xbf16, #tpu.memory_space<vmem>>, vector<128x128xbf16>
    %cst = arith.constant dense<0.000000e+00> : vector<64x128xf32>
    %3 = tpu.matmul %1, %2, %cst {dimension_numbers = #tpu.dot_dimension_numbers<[1], [0], [0], [1], [0, 0, 1, 1], [], []>} : vector<64x128xbf16>, vector<128x128xbf16>, vector<64x128xf32> -> vector<64x128xf32>
    %c0_3 = arith.constant 0 : index
    %c0_4 = arith.constant 0 : index
    %4 = vector.load %arg3[%c0_3, %c0_4] : memref<1x128xf32, #tpu.memory_space<vmem>>, vector<1x128xf32>
    %5 = vector.broadcast %4 : vector<1x128xf32> to vector<64x128xf32>
    %6 = arith.addf %3, %5 : vector<64x128xf32>
    %c0_5 = arith.constant 0 : index
    %c0_6 = arith.constant 0 : index
    %7 = vector.load %arg4[%c0_5, %c0_6] : memref<64x128xf32, #tpu.memory_space<vmem>>, vector<64x128xf32>
    tpu.vector_store %arg4[%c0_5, %c0_6], %6 {strides = array<i32>} : memref<64x128xf32, #tpu.memory_space<vmem>>, vector<64x128xf32>,
    return
  }
  func.func @transform_0(%arg0: i32) -> (i32, i32) {
    %c0_i32 = arith.constant 0 : i32
    %c0_i32_0 = arith.constant 0 : i32
    %c0_i32_1 = arith.constant 0 : i32
    return %c0_i32, %c0_i32_0 : i32, i32
  }
  func.func @transform_1(%arg0: i32) -> (i32, i32) {
    %c0_i32 = arith.constant 0 : i32
    %c0_i32_0 = arith.constant 0 : i32
    return %c0_i32, %arg0 : i32, i32
  }
  func.func @transform_2(%arg0: i32) -> (i32, i32) {
    %c0_i32 = arith.constant 0 : i32
    %c0_i32_0 = arith.constant 0 : i32
    return %c0_i32, %arg0 : i32, i32
  }
  func.func @transform_3(%arg0: i32) -> (i32, i32) {
    %c0_i32 = arith.constant 0 : i32
    %c0_i32_0 = arith.constant 0 : i32
    return %c0_i32, %arg0 : i32, i32
  }
}

</mosaic_0001>

<bundles_post_ra>
// kernel: lm_lstm_forward.3
= control target key start
LH: loop header
LB: loop body
LE: loop exit
PB: predicated region body
PF: predicated region fallthrough
CT: control target
= control target key end

     0   :  { %8 = vsyncpa [#allocation4], 0  ;;  %s915_s0 = inlined_call_operand.vmem [shape: f32[64,128], index: 0, kind: input, shape index: {}]   ;;  %s916_s1 = inlined_call_operand.vmem [shape: bf16[128,256], index: 1, kind: input, shape index: {}]   ;;  %s917_s2 = inlined_call_operand.vmem [shape: f32[1,256], index: 2, kind: input, shape index: {}]   ;;  %s918_s3 = inlined_call_operand.hbm [shape: f32[64,256], index: 3, kind: output, shape index: {}]  }
   0x1   :  { %10 = vsyncpa [#allocation4 + $0x1], 0  ;;  %s742_s12 = smov 0   ;;  %s744_s13 = smov 0  }
   0x2   :  { %s746_s14 = smov 0   ;;  %s748_s15 = smov 0  }
   0x3 LB: > { %s763_s16 = sadd.s32 4294967295, %s716_s15   ;;  %s531_s17 = sadd.s32 4294967294, %s716_s15   ;;  %s716_s15 = sphi %s748_s15, %s924_s15   ;;  %s712_s14 = sphi %s746_s14, %s923_s14   ;;  %s708_s13 = sphi %s744_s13, %s922_s13   ;;  %s704_s12 = sphi %s742_s12, %s921_s12  }
   0x4   : > { %s767_s18 = sadd.s32 1, %s716_s15   ;;  %s44_s19 = sadd.s32 1, %s712_s14 }
   0x5   : > { %s41_s20 = ssub.s32 %s716_s15, %s767_s18  ;;  %p51_p0 = scmp.ne.s32.totalorder %s712_s14, %s708_s13 }
   0x6   : > { %p42_p1 = scmp.eq.s32.totalorder %s41_s20, 0  ;;  %p52_p2 = scmp.eq.s32.totalorder %s716_s15, 0 }
   0x7   : > { %p107_p3 = scmp.eq.s32.totalorder %s763_s16, 1  ;;  %p112_p4 = scmp.ne.s32.totalorder %s708_s13, %s704_s12 }
   0x8   : > { %s779_s21 = scalar_select %p42_p1, %s712_s14, %s44_s19  }
   0x9   : > { %p53_p5 = por %p52_p2, %p51_p0  ;;  %p781_p6 = por %p107_p3, %p51_p0 }
   0xa   : > { %p113_p7 = scmp.eq.s32.totalorder %s531_s17, 1  ;;  %p533_p9 = scmp.ge.s32.totalorder %s716_s15, 2 }
   0xc   : > { %p785_p8 = por %p113_p7, %p112_p4  ;;  %132 = sbr.rel (%p533_p9) target bundleno = 33 (0x21), region = 20 }
  0x13   : > { %135 = sbr.rel (!%p53_p5) target bundleno = 33 (0x21), region = 24  ;;  %s137_s24 = sand.u32 (%p53_p5), 1, %s712_s14  }
  0x14   : > { %s535_s25 = sshll.u32 (%p53_p5), %s716_s15, 2  ;;  %s534_s26 = sshll.u32 (%p53_p5), %s137_s24, 6 }
  0x15   : > { %s797_s29 = scalar_lea.vmem (%p53_p5), %s916_s1, %s535_s25  ;;  %s139_s30 = scalar_lea.vmem (%p53_p5), [#allocation2], %s534_s26 }
  0x16   : > { %v157_v0 = vld [vmem:[%s797_s29] sm:$0xf] (%p53_p5)  ;;  %v159_v1 = vld [vmem:[%s797_s29 + $0x8] sm:$0xf] (%p53_p5)  ;;  %v161_v2 = vld [vmem:[%s797_s29 + $0x10] sm:$0xf] (%p53_p5) }
  0x17   : > { %158 = vst [vmem:[%s139_s30] sm:$0xf] (%p53_p5), %v157_v0  ;;  %160 = vst [vmem:[%s139_s30 + $0x4] sm:$0xf] (%p53_p5), %v159_v1  ;;  %v163_v3 = vld [vmem:[%s797_s29 + $0x18] sm:$0xf] (%p53_p5) }
  0x18   : > { %v165_v4 = vld [vmem:[%s797_s29 + $0x20] sm:$0xf] (%p53_p5)  ;;  %162 = vst [vmem:[%s139_s30 + $0x8] sm:$0xf] (%p53_p5), %v161_v2  ;;  %164 = vst [vmem:[%s139_s30 + $0xc] sm:$0xf] (%p53_p5), %v163_v3 }
  0x19   : > { %166 = vst [vmem:[%s139_s30 + $0x10] sm:$0xf] (%p53_p5), %v165_v4  ;;  %v167_v5 = vld [vmem:[%s797_s29 + $0x28] sm:$0xf] (%p53_p5)  ;;  %v169_v6 = vld [vmem:[%s797_s29 + $0x30] sm:$0xf] (%p53_p5) }
  0x1a   : > { %v171_v7 = vld [vmem:[%s797_s29 + $0x38] sm:$0xf]  ;;  %168 = vst [vmem:[%s139_s30 + $0x14] sm:$0xf] %v167_v5  ;;  %170 = vst [vmem:[%s139_s30 + $0x18] sm:$0xf] %v169_v6 }
  0x1b   : > { %172 = vst [vmem:[%s139_s30 + $0x1c] sm:$0xf] %v171_v7  ;;  %v173_v8 = vld [vmem:[%s797_s29 + $0x40] sm:$0xf]  ;;  %v175_v9 = vld [vmem:[%s797_s29 + $0x48] sm:$0xf] }
  0x1c   : > { %v177_v10 = vld [vmem:[%s797_s29 + $0x50] sm:$0xf]  ;;  %174 = vst [vmem:[%s139_s30 + $0x20] sm:$0xf] %v173_v8  ;;  %176 = vst [vmem:[%s139_s30 + $0x24] sm:$0xf] %v175_v9 }
  0x1d   : > { %178 = vst [vmem:[%s139_s30 + $0x28] sm:$0xf] %v177_v10  ;;  %v179_v11 = vld [vmem:[%s797_s29 + $0x58] sm:$0xf]  ;;  %v181_v12 = vld [vmem:[%s797_s29 + $0x60] sm:$0xf] }
  0x1e   : > { %v183_v13 = vld [vmem:[%s797_s29 + $0x68] sm:$0xf]  ;;  %180 = vst [vmem:[%s139_s30 + $0x2c] sm:$0xf] %v179_v11  ;;  %182 = vst [vmem:[%s139_s30 + $0x30] sm:$0xf] %v181_v12 }
  0x1f   : > { %184 = vst [vmem:[%s139_s30 + $0x34] sm:$0xf] %v183_v13  ;;  %v185_v14 = vld [vmem:[%s797_s29 + $0x70] sm:$0xf]  ;;  %v187_v15 = vld [vmem:[%s797_s29 + $0x78] sm:$0xf] }
  0x20   : > { %186 = vst [vmem:[%s139_s30 + $0x38] sm:$0xf] %v185_v14  ;;  %188 = vst [vmem:[%s139_s30 + $0x3c] sm:$0xf] %v187_v15 }
  0x21 PF: > { %p536_p10 = scmp.ge.s32.totalorder %s716_s15, 1  ;;  %p248_p11 = scmp.lt.s32.totalorder %s716_s15, 3 }
  0x23   : > { %p249_p12 = pnand %p536_p10, %p248_p11 }
  0x24   : > { %s255_s4 = sand.u32 (!%p249_p12), 1, %s708_s13   ;;  %v285_v16 = vld [vmem:[%s915_s0] sm:$0xff] (!%p249_p12)  ;;  %v286_v17 = vld [vmem:[%s915_s0 + $0x8] sm:$0xff] (!%p249_p12)  ;;  %v287_v30 = vld [vmem:[%s915_s0 + $0x10] sm:$0xff] (!%p249_p12)  ;;  %p281_p13 = scmp.lt.s32.totalorder (!%p249_p12), %s763_s16, 1 }
  0x25   : > { %252 = sbr.rel (%p249_p12) target bundleno = 306 (0x132), region = 69  ;;  %v289_v18 = vld [vmem:[%s915_s0 + $0x20] sm:$0xff] (!%p249_p12)  ;;  %s829_s11 = sshll.u32 (!%p249_p12), %s255_s4, 6  ;;  %v293_v19 = vpack.c.bf16 (!%p249_p12), %v286_v17, %v285_v16  ;;  %v290_v20 = vld [vmem:[%s915_s0 + $0x28] sm:$0xff] (!%p249_p12)  ;;  %v288_v31 = vld [vmem:[%s915_s0 + $0x18] sm:$0xff] (!%p249_p12) }
  0x26   : > { %v295_v21 = vpack.c.bf16 (!%p249_p12), %v290_v20, %v289_v18  ;;  %s835_s20 = scalar_lea.vmem (!%p249_p12), [#allocation2], %s829_s11  ;;  %v291_v32 = vld [vmem:[%s915_s0 + $0x30] sm:$0xff] (!%p249_p12)  ;;  %v292_v33 = vld [vmem:[%s915_s0 + $0x38] sm:$0xff] (!%p249_p12)  ;;  %v294_v34 = vpack.c.bf16 (!%p249_p12), %v288_v31, %v287_v30  ;;  %s280_s10 = scalar_lea.vmem (!%p249_p12), [#allocation3], %s829_s11 }
  0x27   : > { %v646_v22 = vld [vmem:[%s835_s20] sm:$0xff] (!%p249_p12)   ;;  %580 = vmatprep.mubr.bf16.mxu0 (!%p249_p12), %v293_v19  ;;  %v647_v23 = vld [vmem:[%s835_s20 + $0x8] sm:$0xff] (!%p249_p12)   ;;  %v648_v24 = vld [vmem:[%s835_s20 + $0x10] sm:$0xff] (!%p249_p12)   ;;  %v296_v35 = vpack.c.bf16 (!%p249_p12), %v292_v33, %v291_v32  ;;  %s454_s17 = sshll.u32 (!%p249_p12), %s280_s10, 4  ;;  %s549_s19 = sshll.u32 (!%p249_p12), %s763_s16, 7  ;;  %s864_s17 = int_to_ptr.vmem [resolvable:$true] %s454_s17 }
  0x28   : > { %584 = vmatprep.mubr.bf16.mxu1 (!%p249_p12), %v295_v21  ;;  %564 = vmatprep.subr.bf16.mxu0 (!%p249_p12), %v646_v22  ;;  %v649_v25 = vld [vmem:[%s835_s20 + $0x18] sm:$0xff] (!%p249_p12)   ;;  %v650_v26 = vld [vmem:[%s835_s20 + $0x20] sm:$0xff] (!%p249_p12)   ;;  %v651_v27 = vld [vmem:[%s835_s20 + $0x28] sm:$0xff] (!%p249_p12)   ;;  %s873_s24 = scalar_lea.sflag (!%p249_p12), [#allocation4], %s255_s4  ;;  %s654_s25 = scalar_lea.vmem (!%p249_p12), %s864_s17, 1024 }
  0x29   : > { %588 = vmatprep.subr.bf16.mxu1 (!%p249_p12), %v646_v22  ;;  %565 = vmatpush3.bf16.msra.mxu0 (!%p249_p12), %v646_v22  ;;  %v652_v28 = vld [vmem:[%s835_s20 + $0x30] sm:$0xff] (!%p249_p12)   ;;  %v653_v29 = vld [vmem:[%s835_s20 + $0x38] sm:$0xff] (!%p249_p12)   ;;  %s869_s20 = scalar_lea.hbm (!%p249_p12), %s918_s3, %s549_s19  ;;  %p655_p0 = scmp.ne.s32.totalorder (!%p249_p12), %s864_s17, %s654_s25 }
  0x2a   : > { %596 = vmatpush3.bf16.msra.mxu1 (!%p249_p12), %v646_v22  ;;  %566 = vmatprep.subr.bf16.mxu0 (!%p249_p12), %v647_v23  ;;  %s718_s26 = smov (!%p249_p12), [#allocation3]  }
  0x2b   : > { %589 = vmatprep.subr.bf16.mxu1 (!%p249_p12), %v647_v23  ;;  %p656_p1 = pnand (!%p249_p12), %p655_p0, %p781_p6  ;;  %s658_s27 = sshll.u32 (!%p249_p12), %s718_s26, 4  ;;  %s659_s27 = int_to_ptr.vmem [resolvable:$false] %s658_s27 }
  0x2c   : > { %s282_s6 = scalar_select %p281_p13, %s763_s16, 1 }
  0x2d   : > { %567 = vmatpush3.bf16.msra.mxu0 %v647_v23  ;;  %p657_p2 = pneg %p656_p1  ;;  %s660_s28 = scalar_lea.vmem %s659_s27, 2048 }
  0x2e   : > { %597 = vmatpush3.bf16.msra.mxu1 %v647_v23  ;;  %568 = vmatprep.subr.bf16.mxu0 %v648_v24  ;;  %s283_s9 = scalar_lea.vmem %s917_s2, %s282_s6  ;;  %p661_p3 = scmp.lt.s32.totalorder %s864_s17, %s659_s27 }
  0x2f   : > { %590 = vmatprep.subr.bf16.mxu1 %v648_v24  ;;  %v539_v36 = vld [vmem:[%s283_s9] ss:$0 sm:$0xff]  ;;  %p662_p4 = scmp.lt.s32.totalorder %s660_s28, %s654_s25 }
  0x31   : > { %569 = vmatpush3.bf16.msra.mxu0 %v648_v24  ;;  %p663_p5 = por %p662_p4, %p661_p3 }
  0x32   : > { %598 = vmatpush3.bf16.msra.mxu1 %v648_v24  ;;  %570 = vmatprep.subr.bf16.mxu0 %v649_v25 }
  0x33   : > { %591 = vmatprep.subr.bf16.mxu1 %v649_v25  ;;  %p664_p7 = pnand %p663_p5, %p657_p2 }
  0x35   : > { %571 = vmatpush3.bf16.msra.mxu0 %v649_v25 }
  0x36   : > { %599 = vmatpush3.bf16.msra.mxu1 %v649_v25  ;;  %572 = vmatprep.subr.bf16.mxu0 %v650_v26 }
  0x37   : > { %592 = vmatprep.subr.bf16.mxu1 %v650_v26 }
  0x39   : > { %573 = vmatpush3.bf16.msra.mxu0 %v650_v26 }
  0x3a   : > { %600 = vmatpush3.bf16.msra.mxu1 %v650_v26  ;;  %574 = vmatprep.subr.bf16.mxu0 %v651_v27 }
  0x3b   : > { %593 = vmatprep.subr.bf16.mxu1 %v651_v27 }
  0x3d   : > { %575 = vmatpush3.bf16.msra.mxu0 %v651_v27 }
  0x3e   : > { %601 = vmatpush3.bf16.msra.mxu1 %v651_v27  ;;  %576 = vmatprep.subr.bf16.mxu0 %v652_v28 }
  0x3f   : > { %594 = vmatprep.subr.bf16.mxu1 %v652_v28 }
  0x41   : > { %577 = vmatpush3.bf16.msra.mxu0 %v652_v28 }
  0x42   : > { %602 = vmatpush3.bf16.msra.mxu1 %v652_v28  ;;  %578 = vmatprep.subr.bf16.mxu0 %v653_v29 }
  0x43   : > { %595 = vmatprep.subr.bf16.mxu1 %v653_v29 }
  0x45   : > { %579 = vmatpush3.bf16.msra.mxu0 %v653_v29 }
  0x46   : > { %603 = vmatpush3.bf16.msra.mxu1 %v653_v29 }
  0x48   : > { %581 = vmatmul.mubr.bf16.vlgmr.msra.gmra.mrb[0].mxu0 %v294_v34 }
  0x49   : > { %585 = vmatmul.mubr.bf16.vlgmr.msra.gmra.mrb[0].mxu1 %v296_v35 }
 0x11b   : > { %v582_v37 = vpop.f32.mrb[0].mxu0 }
 0x11c   : > { %v586_v38 = vpop.f32.mrb[0].mxu1  ;;  %v411_v39 = vadd.f32 %v582_v37, %v539_v36  ;;  %v402_v41 = vpop.f32.mrb[1].mxu0 }
 0x11d   : > { %v427_v40 = vadd.f32 %v586_v38, %v539_v36  ;;  %v418_v42 = vpop.f32.mrb[1].mxu1  ;;  %v403_v43 = vadd.f32 %v539_v36, %v402_v41  ;;  %v583_v45 = vpop.f32.mrb[2].mxu0 }
 0x11e   : > { %v419_v44 = vadd.f32 %v539_v36, %v418_v42  ;;  %v587_v46 = vpop.f32.mrb[2].mxu1  ;;  %435 = vst [vmem:[%s280_s10 + $0x10] sm:$0xff] %v411_v39  ;;  %v414_v47 = vadd.f32 %v583_v45, %v539_v36  ;;  %v405_v49 = vpop.f32.mrb[3].mxu0 }
 0x11f   : > { %439 = vst [vmem:[%s280_s10 + $0x30] sm:$0xff] %v427_v40  ;;  %v430_v48 = vadd.f32 %v587_v46, %v539_v36  ;;  %v421_v50 = vpop.f32.mrb[3].mxu1  ;;  %433 = vst [vmem:[%s280_s10] sm:$0xff] %v403_v43  ;;  %v406_v51 = vadd.f32 %v539_v36, %v405_v49 }
 0x120   : > { %437 = vst [vmem:[%s280_s10 + $0x20] sm:$0xff] %v419_v44  ;;  %v422_v52 = vadd.f32 %v539_v36, %v421_v50  ;;  %436 = vst [vmem:[%s280_s10 + $0x18] sm:$0xff] %v414_v47 }
 0x121   : > { %440 = vst [vmem:[%s280_s10 + $0x38] sm:$0xff] %v430_v48  ;;  %434 = vst [vmem:[%s280_s10 + $0x8] sm:$0xff] %v406_v51 }
 0x122   : > { %438 = vst [vmem:[%s280_s10 + $0x28] sm:$0xff] %v422_v52 }
 0x123   : > { %667 = shalt.err (!%p664_p7)
}
 0x124   : > { %s668_s4 = scalar_lea.hbm %s869_s20, 1024  ;;  %s672_s5 = scalar_lea.hbm %s918_s3, 2048 }
 0x125   : > { %p669_p10 = scmp.ne.s32.totalorder %s869_s20, %s668_s4  ;;  %p673_p13 = scmp.lt.u32.totalorder %s869_s20, %s918_s3 }
 0x126   : > { %p674_p0 = scmp.lt.u32.totalorder %s672_s5, %s668_s4  ;;  %p676_p2 = scmp.lt.u32.totalorder %s668_s4, %s869_s20 }
 0x127   : > { %p670_p11 = pnand %p669_p10, %p781_p6 }
 0x128   : > { %p675_p1 = por %p674_p0, %p673_p13 }
 0x129   : > { %p671_p12 = pneg %p670_p11 }
 0x12a   : > { %p677_p3 = por %p676_p2, %p675_p1 }
 0x12c   : > { %p678_p4 = pnand %p677_p3, %p671_p12 }
 0x12e   : > { %681 = shalt.err (!%p678_p4)
}
 0x12f   : > { %s719_s8 = smov 128   ;;  %s720_s9 = smov 256  }
 0x130   : > { %s721_s10 = smov 8  }
 0x131   : > { %604 = dma.vmem_to_hbm [thread:$0]  (%p781_p6), %s864_s17, 1024, %s869_s20, %s873_s24, %s719_s8, %s720_s9, %s721_s10  }
 0x132 PF: > { %s469_s19 = sand.u32 1, %s704_s12   ;;  %p607_p5 = pnand %p533_p9, %p785_p8 }
 0x133   : > { %s470_s16 = scalar_lea.sflag [#allocation4], %s469_s19 }
 0x134   : > { %699 = dma.done.wait (!%p607_p5), %s470_s16, 1024  }
 0x135   : > { %701 = vsyncadd (!%p607_p5), %s470_s16, 4294966272  ;;  %p13_p7 = scmp.ge.s32.totalorder %s767_s18, 4   ;;  %s921_s12 = smov %s708_s13 }
 0x136   : > { %s922_s13 = smov %s712_s14  ;;  %s923_s14 = smov %s779_s21 }
 0x137   : > { %s924_s15 = smov %s767_s18  ;;  %15 = sbr.rel (!%p13_p7) target bundleno = 3 (0x3), region = 116 }
 0x13e   :  { %475 = vsyncpa [#allocation4], 1 }
 0x13f   :  { %477 = vsyncpa [#allocation4 + $0x1], 1 }

// kernel: lm_lstm_forward.2
= control target key start
LH: loop header
LB: loop body
LE: loop exit
PB: predicated region body
PF: predicated region fallthrough
CT: control target
= control target key end

     0   :  { %14 = vsyncpa [#allocation4], 0  ;;  %s1417_s0 = inlined_call_operand.vmem [shape: bf16[64,128], index: 0, kind: input, shape index: {}]   ;;  %s1418_s1 = inlined_call_operand.vmem [shape: bf16[128,512], index: 1, kind: input, shape index: {}]   ;;  %s1419_s2 = inlined_call_operand.vmem [shape: bf16[128,512], index: 2, kind: input, shape index: {}]   ;;  %s1420_s3 = inlined_call_operand.vmem [shape: f32[1,512], index: 3, kind: input, shape index: {}]   ;;  %s1421_s4 = inlined_call_operand.vmem [shape: f32[8,128], index: 4, kind: input, shape index: {}]   ;;  %s1422_s5 = inlined_call_operand.vmem [shape: f32[8,128], index: 5, kind: input, shape index: {}]   ;;  %s1423_s6 = inlined_call_operand.vmem [shape: f32[64,128], index: 6, kind: output, shape index: {0}]   ;;  %s1424_s7 = inlined_call_operand.hbm [shape: f32[8,128], index: 7, kind: output, shape index: {1}]   ;;  %s1425_s8 = inlined_call_operand.hbm [shape: f32[8,128], index: 8, kind: output, shape index: {2}]  }
   0x1   :  { %15 = vsyncpa [#allocation6], 0  ;;  %v901_v0 = vld [vmem:[%s1418_s1 + $0x4] ss:$16 sps:$4 sm:$0xff]   ;;  %v1067_v1 = vmov 0   ;;  %v950_v34 = vld [vmem:[%s1417_s0 + $0x8] sm:$0xff]   ;;  %v71_v39 = vlaneseq }
   0x2   :  { %307 = vmatprep.mubr.bf16.mxu0 %v1067_v1  ;;  %380 = vmatprep.mubr.bf16.mxu1 %v1067_v1  ;;  %v903_v2 = vld [vmem:[%s1418_s1 + $0xc] ss:$16 sps:$4 sm:$0xff]   ;;  %v905_v3 = vld [vmem:[%s1418_s1] ss:$16 sps:$4 sm:$0xff]   ;;  %v906_v4 = vld [vmem:[%s1418_s1 + $0x8] ss:$16 sps:$4 sm:$0xff]  }
   0x3   :  { %275 = vmatprep.subr.bf16.mxu0 %v901_v0  ;;  %v907_v5 = vld [vmem:[%s1418_s1 + $0x24] ss:$16 sps:$4 sm:$0xff]   ;;  %348 = vmatprep.subr.bf16.mxu1 %v903_v2  ;;  %v909_v6 = vld [vmem:[%s1418_s1 + $0x2c] ss:$16 sps:$4 sm:$0xff]   ;;  %v911_v7 = vld [vmem:[%s1418_s1 + $0x20] ss:$16 sps:$4 sm:$0xff]  }
   0x4   :  { %276 = vmatpush1.bf16.msra.mxu0 %v905_v3  ;;  %349 = vmatpush1.bf16.msra.mxu1 %v906_v4  ;;  %v912_v8 = vld [vmem:[%s1418_s1 + $0x28] ss:$16 sps:$4 sm:$0xff]   ;;  %v913_v9 = vld [vmem:[%s1418_s1 + $0x44] ss:$16 sps:$4 sm:$0xff]   ;;  %v915_v10 = vld [vmem:[%s1418_s1 + $0x4c] ss:$16 sps:$4 sm:$0xff]  }
   0x5   :  { %277 = vmatprep.subr.bf16.mxu0 %v907_v5  ;;  %350 = vmatprep.subr.bf16.mxu1 %v909_v6  ;;  %v917_v11 = vld [vmem:[%s1418_s1 + $0x40] ss:$16 sps:$4 sm:$0xff]   ;;  %v918_v12 = vld [vmem:[%s1418_s1 + $0x48] ss:$16 sps:$4 sm:$0xff]   ;;  %v919_v13 = vld [vmem:[%s1418_s1 + $0x64] ss:$16 sps:$4 sm:$0xff]  }
   0x6   :  { %v921_v14 = vld [vmem:[%s1418_s1 + $0x6c] ss:$16 sps:$4 sm:$0xff]   ;;  %v923_v15 = vld [vmem:[%s1418_s1 + $0x60] ss:$16 sps:$4 sm:$0xff]   ;;  %v924_v16 = vld [vmem:[%s1418_s1 + $0x68] ss:$16 sps:$4 sm:$0xff]  }
   0x7   :  { %v925_v17 = vld [vmem:[%s1418_s1 + $0x84] ss:$16 sps:$4 sm:$0xff]   ;;  %v927_v18 = vld [vmem:[%s1418_s1 + $0x8c] ss:$16 sps:$4 sm:$0xff]   ;;  %v929_v19 = vld [vmem:[%s1418_s1 + $0x80] ss:$16 sps:$4 sm:$0xff]  }
   0x8   :  { %278 = vmatpush1.bf16.msra.mxu0 %v911_v7  ;;  %351 = vmatpush1.bf16.msra.mxu1 %v912_v8  ;;  %v930_v20 = vld [vmem:[%s1418_s1 + $0x88] ss:$16 sps:$4 sm:$0xff]   ;;  %v931_v21 = vld [vmem:[%s1418_s1 + $0xa4] ss:$16 sps:$4 sm:$0xff]   ;;  %v933_v22 = vld [vmem:[%s1418_s1 + $0xac] ss:$16 sps:$4 sm:$0xff]  }
   0x9   :  { %279 = vmatprep.subr.bf16.mxu0 %v913_v9  ;;  %352 = vmatprep.subr.bf16.mxu1 %v915_v10  ;;  %v935_v23 = vld [vmem:[%s1418_s1 + $0xa0] ss:$16 sps:$4 sm:$0xff]   ;;  %v936_v24 = vld [vmem:[%s1418_s1 + $0xa8] ss:$16 sps:$4 sm:$0xff]   ;;  %v937_v25 = vld [vmem:[%s1418_s1 + $0xc4] ss:$16 sps:$4 sm:$0xff]  }
   0xa   :  { %v939_v26 = vld [vmem:[%s1418_s1 + $0xcc] ss:$16 sps:$4 sm:$0xff]   ;;  %v941_v27 = vld [vmem:[%s1418_s1 + $0xc0] ss:$16 sps:$4 sm:$0xff]   ;;  %v942_v28 = vld [vmem:[%s1418_s1 + $0xc8] ss:$16 sps:$4 sm:$0xff]  }
   0xb   :  { %v943_v29 = vld [vmem:[%s1418_s1 + $0xe4] ss:$16 sps:$4 sm:$0xff]   ;;  %v945_v30 = vld [vmem:[%s1418_s1 + $0xec] ss:$16 sps:$4 sm:$0xff]   ;;  %v947_v31 = vld [vmem:[%s1418_s1 + $0xe0] ss:$16 sps:$4 sm:$0xff]  }
   0xc   :  { %280 = vmatpush1.bf16.msra.mxu0 %v917_v11  ;;  %353 = vmatpush1.bf16.msra.mxu1 %v918_v12  ;;  %v948_v32 = vld [vmem:[%s1418_s1 + $0xe8] ss:$16 sps:$4 sm:$0xff]   ;;  %v949_v33 = vld [vmem:[%s1417_s0] sm:$0xff]   ;;  %v951_v35 = vld [vmem:[%s1417_s0 + $0x10] sm:$0xff]   ;;  %v72_v40 = vshrl.u32 %v71_v39, 7 }
   0xd   :  { %281 = vmatprep.subr.bf16.mxu0 %v919_v13  ;;  %354 = vmatprep.subr.bf16.mxu1 %v921_v14  ;;  %v952_v36 = vld [vmem:[%s1417_s0 + $0x18] sm:$0xff]   ;;  %v453_v37 = vld [vmem:[%s1421_s4] sm:$0xff]  ;;  %s1281_s0 = smov 0  }
   0xe   :  { %v455_v38 = vld [vmem:[%s1422_s5] sm:$0xff]  ;;  %454 = vst [vmem:[#allocation3] sm:$0xff] %v453_v37  ;;  %v73_v41 = vsub.s32 0, %v72_v40  ;;  %v81_v43 = vsub.s32 2, %v72_v40  ;;  %v77_v44 = vsub.s32 1, %v72_v40  ;;  %v85_v45 = vsub.s32 3, %v72_v40 }
   0xf   :  { %456 = vst [vmem:[#allocation5] sm:$0xff] %v455_v38  ;;  %v69_v42 = vld [vmem:[%s1420_s3] sm:$0xf] }
  0x10   :  { %282 = vmatpush1.bf16.msra.mxu0 %v923_v15  ;;  %355 = vmatpush1.bf16.msra.mxu1 %v924_v16  ;;  %v1241_v46 = vrot.slane %v69_v42, %v73_v41  ;;  %v1243_v47 = vrot.slane %v69_v42, %v81_v43  ;;  %v1245_v48 = vrot.slane %v69_v42, %v77_v44 }
  0x11   :  { %283 = vmatprep.subr.bf16.mxu0 %v925_v17  ;;  %356 = vmatprep.subr.bf16.mxu1 %v927_v18  ;;  %v1247_v49 = vrot.slane %v69_v42, %v85_v45 }
  0x14   :  { %284 = vmatpush1.bf16.msra.mxu0 %v929_v19  ;;  %357 = vmatpush1.bf16.msra.mxu1 %v930_v20 }
  0x15   :  { %285 = vmatprep.subr.bf16.mxu0 %v931_v21  ;;  %358 = vmatprep.subr.bf16.mxu1 %v933_v22 }
  0x18   :  { %286 = vmatpush1.bf16.msra.mxu0 %v935_v23  ;;  %359 = vmatpush1.bf16.msra.mxu1 %v936_v24 }
  0x19   :  { %287 = vmatprep.subr.bf16.mxu0 %v937_v25  ;;  %360 = vmatprep.subr.bf16.mxu1 %v939_v26 }
  0x1c   :  { %288 = vmatpush1.bf16.msra.mxu0 %v941_v27  ;;  %361 = vmatpush1.bf16.msra.mxu1 %v942_v28 }
  0x1d   :  { %289 = vmatprep.subr.bf16.mxu0 %v943_v29  ;;  %362 = vmatprep.subr.bf16.mxu1 %v945_v30 }
  0x20   :  { %290 = vmatpush1.bf16.msra.mxu0 %v947_v31  ;;  %363 = vmatpush1.bf16.msra.mxu1 %v948_v32 }
  0x23   :  { %308 = vmatmul.mubr.bf16.vlgmr.msra.gmra.mrb[0].mxu0 %v949_v33  ;;  %381 = vmatmul.mubr.bf16.vlgmr.msra.gmra.mrb[0].mxu1 %v949_v33 }
  0x24   :  { %317 = vmatprep.mubr.bf16.mxu0 %v1067_v1  ;;  %390 = vmatprep.mubr.bf16.mxu1 %v1067_v1 }
  0x2b   :  { %318 = vmatmul.mubr.bf16.gmra.mrb[4].mxu0 %v950_v34  ;;  %391 = vmatmul.mubr.bf16.gmra.mrb[4].mxu1 %v950_v34 }
  0x2c   :  { %327 = vmatprep.mubr.bf16.mxu0 %v1067_v1  ;;  %400 = vmatprep.mubr.bf16.mxu1 %v1067_v1 }
  0x33   :  { %328 = vmatmul.mubr.bf16.gmra.mrb[8].mxu0 %v951_v35  ;;  %401 = vmatmul.mubr.bf16.gmra.mrb[8].mxu1 %v951_v35 }
  0x34   :  { %337 = vmatprep.mubr.bf16.mxu0 %v1067_v1  ;;  %410 = vmatprep.mubr.bf16.mxu1 %v1067_v1 }
  0x3b   :  { %338 = vmatmul.mubr.bf16.gmra.mrb[12].mxu0 %v952_v36  ;;  %411 = vmatmul.mubr.bf16.gmra.mrb[12].mxu1 %v952_v36 }
  0xf6   :  { %v309_v50 = vpop.f32.mrb[0].mxu0  ;;  %v382_v52 = vpop.f32.mrb[0].mxu1 }
  0xf7   :  { %v310_v51 = vadd.f32 %v309_v50, %v1241_v46  ;;  %v311_v53 = vpop.f32.mrb[1].mxu0  ;;  %v383_v54 = vadd.f32 %v382_v52, %v1243_v47  ;;  %v384_v56 = vpop.f32.mrb[1].mxu1 }
  0xf8   :  { %v312_v55 = vadd.f32 %v311_v53, %v1245_v48  ;;  %v313_v57 = vpop.f32.mrb[2].mxu0  ;;  %v385_v58 = vadd.f32 %v384_v56, %v1247_v49  ;;  %v386_v60 = vpop.f32.mrb[2].mxu1 }
  0xf9   :  { %421 = vst [vmem:[#allocation2] sm:$0xff] %v310_v51  ;;  %v314_v59 = vadd.f32 %v313_v57, %v1241_v46  ;;  %v315_v61 = vpop.f32.mrb[3].mxu0  ;;  %423 = vst [vmem:[#allocation2 + $0x10] sm:$0xff] %v383_v54  ;;  %v387_v62 = vadd.f32 %v386_v60, %v1243_v47  ;;  %v388_v0 = vpop.f32.mrb[3].mxu1 }
  0xfa   :  { %422 = vst [vmem:[#allocation2 + $0x8] sm:$0xff] %v312_v55  ;;  %v316_v63 = vadd.f32 %v315_v61, %v1245_v48  ;;  %424 = vst [vmem:[#allocation2 + $0x18] sm:$0xff] %v385_v58  ;;  %v389_v1 = vadd.f32 %v388_v0, %v1247_v49 }
  0xfb   :  { %425 = vst [vmem:[#allocation2 + $0x20] sm:$0xff] %v314_v59  ;;  %427 = vst [vmem:[#allocation2 + $0x30] sm:$0xff] %v387_v62 }
  0xfc   :  { %426 = vst [vmem:[#allocation2 + $0x28] sm:$0xff] %v316_v63  ;;  %428 = vst [vmem:[#allocation2 + $0x38] sm:$0xff] %v389_v1 }
  0xfe   :  { %v319_v2 = vpop.f32.mrb[4].mxu0  ;;  %v392_v4 = vpop.f32.mrb[4].mxu1 }
  0xff   :  { %v320_v3 = vadd.f32 %v319_v2, %v1241_v46  ;;  %v321_v5 = vpop.f32.mrb[5].mxu0  ;;  %v393_v6 = vadd.f32 %v392_v4, %v1243_v47  ;;  %v394_v8 = vpop.f32.mrb[5].mxu1 }
 0x100   :  { %v322_v7 = vadd.f32 %v321_v5, %v1245_v48  ;;  %v323_v9 = vpop.f32.mrb[6].mxu0  ;;  %v395_v10 = vadd.f32 %v394_v8, %v1247_v49  ;;  %v396_v12 = vpop.f32.mrb[6].mxu1 }
 0x101   :  { %429 = vst [vmem:[#allocation2 + $0x40] sm:$0xff] %v320_v3  ;;  %v324_v11 = vadd.f32 %v323_v9, %v1241_v46  ;;  %v325_v13 = vpop.f32.mrb[7].mxu0  ;;  %431 = vst [vmem:[#allocation2 + $0x50] sm:$0xff] %v393_v6  ;;  %v397_v14 = vadd.f32 %v396_v12, %v1243_v47  ;;  %v398_v16 = vpop.f32.mrb[7].mxu1 }
 0x102   :  { %430 = vst [vmem:[#allocation2 + $0x48] sm:$0xff] %v322_v7  ;;  %v326_v15 = vadd.f32 %v325_v13, %v1245_v48  ;;  %432 = vst [vmem:[#allocation2 + $0x58] sm:$0xff] %v395_v10  ;;  %v399_v17 = vadd.f32 %v398_v16, %v1247_v49 }
 0x103   :  { %433 = vst [vmem:[#allocation2 + $0x60] sm:$0xff] %v324_v11  ;;  %435 = vst [vmem:[#allocation2 + $0x70] sm:$0xff] %v397_v14 }
 0x104   :  { %434 = vst [vmem:[#allocation2 + $0x68] sm:$0xff] %v326_v15  ;;  %436 = vst [vmem:[#allocation2 + $0x78] sm:$0xff] %v399_v17 }
 0x106   :  { %v329_v18 = vpop.f32.mrb[8].mxu0  ;;  %v402_v20 = vpop.f32.mrb[8].mxu1 }
 0x107   :  { %v330_v19 = vadd.f32 %v329_v18, %v1241_v46  ;;  %v331_v21 = vpop.f32.mrb[9].mxu0  ;;  %v403_v22 = vadd.f32 %v402_v20, %v1243_v47  ;;  %v404_v24 = vpop.f32.mrb[9].mxu1 }
 0x108   :  { %v332_v23 = vadd.f32 %v331_v21, %v1245_v48  ;;  %v333_v25 = vpop.f32.mrb[10].mxu0  ;;  %v405_v26 = vadd.f32 %v404_v24, %v1247_v49  ;;  %v406_v28 = vpop.f32.mrb[10].mxu1 }
 0x109   :  { %437 = vst [vmem:[#allocation2 + $0x80] sm:$0xff] %v330_v19  ;;  %v334_v27 = vadd.f32 %v333_v25, %v1241_v46  ;;  %v335_v29 = vpop.f32.mrb[11].mxu0  ;;  %439 = vst [vmem:[#allocation2 + $0x90] sm:$0xff] %v403_v22  ;;  %v407_v30 = vadd.f32 %v406_v28, %v1243_v47  ;;  %v408_v32 = vpop.f32.mrb[11].mxu1 }
 0x10a   :  { %438 = vst [vmem:[#allocation2 + $0x88] sm:$0xff] %v332_v23  ;;  %v336_v31 = vadd.f32 %v335_v29, %v1245_v48  ;;  %440 = vst [vmem:[#allocation2 + $0x98] sm:$0xff] %v405_v26  ;;  %v409_v33 = vadd.f32 %v408_v32, %v1247_v49 }
 0x10b   :  { %441 = vst [vmem:[#allocation2 + $0xa0] sm:$0xff] %v334_v27  ;;  %443 = vst [vmem:[#allocation2 + $0xb0] sm:$0xff] %v407_v30 }
 0x10c   :  { %442 = vst [vmem:[#allocation2 + $0xa8] sm:$0xff] %v336_v31  ;;  %444 = vst [vmem:[#allocation2 + $0xb8] sm:$0xff] %v409_v33 }
 0x10e   :  { %v339_v34 = vpop.f32.mrb[12].mxu0  ;;  %v412_v36 = vpop.f32.mrb[12].mxu1 }
 0x10f   :  { %v340_v35 = vadd.f32 %v339_v34, %v1241_v46  ;;  %v341_v37 = vpop.f32.mrb[13].mxu0  ;;  %v413_v38 = vadd.f32 %v412_v36, %v1243_v47  ;;  %v414_v40 = vpop.f32.mrb[13].mxu1 }
 0x110   :  { %v342_v39 = vadd.f32 %v341_v37, %v1245_v48  ;;  %v343_v41 = vpop.f32.mrb[14].mxu0  ;;  %v415_v42 = vadd.f32 %v414_v40, %v1247_v49  ;;  %v416_v44 = vpop.f32.mrb[14].mxu1 }
 0x111   :  { %445 = vst [vmem:[#allocation2 + $0xc0] sm:$0xff] %v340_v35  ;;  %v344_v43 = vadd.f32 %v343_v41, %v1241_v46  ;;  %v345_v45 = vpop.f32.mrb[15].mxu0  ;;  %447 = vst [vmem:[#allocation2 + $0xd0] sm:$0xff] %v413_v38  ;;  %v417_v50 = vadd.f32 %v416_v44, %v1243_v47  ;;  %v418_v52 = vpop.f32.mrb[15].mxu1 }
 0x112   :  { %446 = vst [vmem:[#allocation2 + $0xc8] sm:$0xff] %v342_v39  ;;  %v346_v51 = vadd.f32 %v345_v45, %v1245_v48  ;;  %448 = vst [vmem:[#allocation2 + $0xd8] sm:$0xff] %v415_v42  ;;  %v419_v53 = vadd.f32 %v418_v52, %v1247_v49 }
 0x113   :  { %449 = vst [vmem:[#allocation2 + $0xe0] sm:$0xff] %v344_v43  ;;  %451 = vst [vmem:[#allocation2 + $0xf0] sm:$0xff] %v417_v50 }
 0x114   :  { %450 = vst [vmem:[#allocation2 + $0xe8] sm:$0xff] %v346_v51  ;;  %452 = vst [vmem:[#allocation2 + $0xf8] sm:$0xff] %v419_v53 }
 0x115 LB: > { %v953_v46 = vld [vmem:[%s1419_s2 + $0x4] ss:$16 sps:$4 sm:$0xff]   ;;  %v955_v47 = vld [vmem:[%s1419_s2] ss:$16 sps:$4 sm:$0xff]   ;;  %v1068_v48 = vmov 0   ;;  %s853_s25 = sshll.u32 %s1065_s0, 3  ;;  %s1065_s0 = sphi %s1281_s0, %s462_s0  }
 0x116   : > { %700 = vmatprep.mubr.bf16.mxu0 %v1068_v48  ;;  %741 = vmatprep.mubr.bf16.mxu1 %v1068_v48  ;;  %v956_v49 = vld [vmem:[%s1419_s2 + $0x24] ss:$16 sps:$4 sm:$0xff]   ;;  %v958_v54 = vld [vmem:[%s1419_s2 + $0xc] ss:$16 sps:$4 sm:$0xff]   ;;  %v960_v55 = vld [vmem:[%s1419_s2 + $0x20] ss:$16 sps:$4 sm:$0xff]   ;;  %s774_s30 = scalar_lea.vmem %s1423_s6, %s853_s25 }
 0x117   : > { %668 = vmatprep.subr.bf16.mxu0 %v953_v46  ;;  %v961_v56 = vld [vmem:[%s1419_s2 + $0x8] ss:$16 sps:$4 sm:$0xff]   ;;  %v962_v57 = vld [vmem:[%s1419_s2 + $0x44] ss:$16 sps:$4 sm:$0xff]   ;;  %709 = vmatprep.subr.bf16.mxu1 %v958_v54  ;;  %v964_v58 = vld [vmem:[%s1419_s2 + $0x2c] ss:$16 sps:$4 sm:$0xff]  }
 0x118   : > { %669 = vmatpush1.bf16.msra.mxu0 %v955_v47  ;;  %710 = vmatpush1.bf16.msra.mxu1 %v961_v56  ;;  %v967_v59 = vld [vmem:[%s1419_s2 + $0x28] ss:$16 sps:$4 sm:$0xff]   ;;  %v966_v60 = vld [vmem:[%s1419_s2 + $0x40] ss:$16 sps:$4 sm:$0xff]   ;;  %v968_v61 = vld [vmem:[%s1419_s2 + $0x64] ss:$16 sps:$4 sm:$0xff]  }
 0x119   : > { %670 = vmatprep.subr.bf16.mxu0 %v956_v49  ;;  %711 = vmatprep.subr.bf16.mxu1 %v964_v58  ;;  %v970_v62 = vld [vmem:[%s1419_s2 + $0x4c] ss:$16 sps:$4 sm:$0xff]   ;;  %v973_v63 = vld [vmem:[%s1419_s2 + $0x48] ss:$16 sps:$4 sm:$0xff]   ;;  %v972_v0 = vld [vmem:[%s1419_s2 + $0x60] ss:$16 sps:$4 sm:$0xff]  }
 0x11a   : > { %v976_v1 = vld [vmem:[%s1419_s2 + $0x6c] ss:$16 sps:$4 sm:$0xff]   ;;  %v974_v2 = vld [vmem:[%s1419_s2 + $0x84] ss:$16 sps:$4 sm:$0xff]   ;;  %v978_v3 = vld [vmem:[%s1419_s2 + $0x80] ss:$16 sps:$4 sm:$0xff]  }
 0x11b   : > { %v979_v4 = vld [vmem:[%s1419_s2 + $0x68] ss:$16 sps:$4 sm:$0xff]   ;;  %v982_v5 = vld [vmem:[%s1419_s2 + $0x8c] ss:$16 sps:$4 sm:$0xff]   ;;  %v980_v6 = vld [vmem:[%s1419_s2 + $0xa4] ss:$16 sps:$4 sm:$0xff]  }
 0x11c   : > { %671 = vmatpush1.bf16.msra.mxu0 %v960_v55  ;;  %712 = vmatpush1.bf16.msra.mxu1 %v967_v59  ;;  %v985_v7 = vld [vmem:[%s1419_s2 + $0x88] ss:$16 sps:$4 sm:$0xff]   ;;  %v984_v8 = vld [vmem:[%s1419_s2 + $0xa0] ss:$16 sps:$4 sm:$0xff]   ;;  %v988_v9 = vld [vmem:[%s1419_s2 + $0xac] ss:$16 sps:$4 sm:$0xff]  }
 0x11d   : > { %672 = vmatprep.subr.bf16.mxu0 %v962_v57  ;;  %713 = vmatprep.subr.bf16.mxu1 %v970_v62  ;;  %v986_v10 = vld [vmem:[%s1419_s2 + $0xc4] ss:$16 sps:$4 sm:$0xff]   ;;  %v991_v11 = vld [vmem:[%s1419_s2 + $0xa8] ss:$16 sps:$4 sm:$0xff]   ;;  %v990_v12 = vld [vmem:[%s1419_s2 + $0xc0] ss:$16 sps:$4 sm:$0xff]  }
 0x11e   : > { %v994_v13 = vld [vmem:[%s1419_s2 + $0xcc] ss:$16 sps:$4 sm:$0xff]   ;;  %v992_v14 = vld [vmem:[%s1419_s2 + $0xe4] ss:$16 sps:$4 sm:$0xff]   ;;  %v997_v15 = vld [vmem:[%s1419_s2 + $0xc8] ss:$16 sps:$4 sm:$0xff]  }
 0x11f   : > { %v996_v16 = vld [vmem:[%s1419_s2 + $0xe0] ss:$16 sps:$4 sm:$0xff]   ;;  %v998_v18 = vld [vmem:[%s1419_s2 + $0xec] ss:$16 sps:$4 sm:$0xff]   ;;  %v1000_v20 = vld [vmem:[%s1419_s2 + $0xe8] ss:$16 sps:$4 sm:$0xff]  }
 0x120   : > { %673 = vmatpush1.bf16.msra.mxu0 %v966_v60  ;;  %714 = vmatpush1.bf16.msra.mxu1 %v973_v63  ;;  %v464_v17 = vld [vmem:[#allocation3] sm:$0xff]  ;;  %s466_s26 = sshra.s32 %s853_s25, 3  ;;  %v465_v50 = vld [vmem:[#allocation5] sm:$0xff]  ;;  %s462_s0 = sadd.s32 1, %s1065_s0  }
 0x121   : > { %674 = vmatprep.subr.bf16.mxu0 %v968_v61  ;;  %715 = vmatprep.subr.bf16.mxu1 %v976_v1  ;;  %v475_v19 = vpack.c.bf16 %v464_v17, %v464_v17  ;;  %s888_s27 = sshll.u32 %s466_s26, 5  ;;  %p459_p0 = scmp.ge.s32.totalorder %s462_s0, 8  }
 0x122   : > { %s470_s28 = scalar_lea.vmem [#allocation2], %s888_s27  ;;  %s1069_s9 = smov (%p459_p0), [#allocation3]  }
 0x123   : > { %v471_v21 = vld [vmem:[%s470_s28] sm:$0xff]  ;;  %v472_v22 = vld [vmem:[%s470_s28 + $0x8] sm:$0xff]  ;;  %v473_v26 = vld [vmem:[%s470_s28 + $0x10] sm:$0xff]  ;;  %s784_s10 = sshll.u32 (%p459_p0), %s1069_s9, 4  ;;  %s1070_s11 = smov (%p459_p0), [#allocation5]   ;;  %s785_s10 = int_to_ptr.vmem [resolvable:$true] %s784_s10 }
 0x124   : > { %675 = vmatpush1.bf16.msra.mxu0 %v972_v0  ;;  %716 = vmatpush1.bf16.msra.mxu1 %v979_v4  ;;  %v474_v36 = vld [vmem:[%s470_s28 + $0x18] sm:$0xff]  ;;  %s794_s12 = sshll.u32 (%p459_p0), %s1070_s11, 4  ;;  %s1011_s13 = scalar_lea.vmem (%p459_p0), %s785_s10, 128  ;;  %s795_s12 = int_to_ptr.vmem [resolvable:$true] %s794_s12 }
 0x125   : > { %676 = vmatprep.subr.bf16.mxu0 %v974_v2  ;;  %717 = vmatprep.subr.bf16.mxu1 %v982_v5  ;;  %p1012_p1 = scmp.ne.s32.totalorder (%p459_p0), %s785_s10, %s1011_s13  ;;  %p1016_p2 = scmp.lt.s32.totalorder (%p459_p0), %s785_s10, %s785_s10 }
 0x126   :  { %p1017_p3 = scmp.lt.s32.totalorder (%p459_p0), %s1011_s13, %s1011_s13 }
 0x128   : > { %677 = vmatpush1.bf16.msra.mxu0 %v978_v3  ;;  %718 = vmatpush1.bf16.msra.mxu1 %v985_v7  ;;  %p1018_p4 = por (%p459_p0), %p1017_p3, %p1016_p2 }
 0x129   : > { %678 = vmatprep.subr.bf16.mxu0 %v980_v6  ;;  %719 = vmatprep.subr.bf16.mxu1 %v988_v9 }
 0x12a   :  { %p1019_p5 = pnand (%p459_p0), %p1018_p4, %p1012_p1 }
 0x12c   : > { %679 = vmatpush1.bf16.msra.mxu0 %v984_v8  ;;  %720 = vmatpush1.bf16.msra.mxu1 %v991_v11 }
 0x12d   : > { %680 = vmatprep.subr.bf16.mxu0 %v986_v10  ;;  %721 = vmatprep.subr.bf16.mxu1 %v994_v13 }
 0x130   : > { %681 = vmatpush1.bf16.msra.mxu0 %v990_v12  ;;  %722 = vmatpush1.bf16.msra.mxu1 %v997_v15 }
 0x131   : > { %682 = vmatprep.subr.bf16.mxu0 %v992_v14  ;;  %723 = vmatprep.subr.bf16.mxu1 %v998_v18 }
 0x134   : > { %683 = vmatpush1.bf16.msra.mxu0 %v996_v16  ;;  %724 = vmatpush1.bf16.msra.mxu1 %v1000_v20 }
 0x137   : > { %701 = vmatmul.mubr.bf16.vlgmr.msra.gmra.mrb[0].mxu0 %v475_v19  ;;  %742 = vmatmul.mubr.bf16.vlgmr.msra.gmra.mrb[0].mxu1 %v475_v19 }
 0x20a   : > { %v702_v23 = vpop.f32.mrb[0].mxu0  ;;  %v743_v31 = vpop.f32.mrb[0].mxu1 }
 0x20b   : > { %v750_v24 = vadd.f32 %v702_v23, %v471_v21  ;;  %v704_v25 = vpop.f32.mrb[1].mxu0  ;;  %v752_v33 = vadd.f32 %v743_v31, %v473_v26  ;;  %v745_v34 = vpop.f32.mrb[1].mxu1 }
 0x20c   : > { %v751_v27 = vadd.f32 %v704_v25, %v472_v22  ;;  %v706_v28 = vpop.f32.mrb[2].mxu0  ;;  %v747_v35 = vpop.f32.mrb[2].mxu1  ;;  %v753_v38 = vadd.f32 %v745_v34, %v474_v36 }
 0x20d   : > { %v754_v29 = vmul.f32 0.5, %v750_v24  ;;  %v707_v30 = vpop.f32.mrb[3].mxu0  ;;  %v748_v37 = vpop.f32.mrb[3].mxu1 }
 0x20e   : > { %v758_v32 = vmul.f32 0.5, %v751_v27  ;;  %v763_v39 = vmul.f32 0.5, %v753_v38 }
 0x20f   : > { %1001 = vtanh.f32 %v754_v29 }
 0x210   : > { %1003 = vtanh.f32 %v758_v32 }
 0x211   : > { %1005 = vtanh.f32 %v752_v33 }
 0x212   : > { %1007 = vtanh.f32 %v763_v39 }
 0x219   : > { %v1002_v40 = vpop.eup %1001 }
 0x21a   : > { %v1004_v41 = vpop.eup %1003  ;;  %v756_v42 = vmul.f32 0.5, %v1002_v40 }
 0x21b   : > { %v1006_v43 = vpop.eup %1005  ;;  %v760_v44 = vmul.f32 0.5, %v1004_v41 }
 0x21c   : > { %v757_v45 = vadd.f32 0.5, %v756_v42  ;;  %v1008_v47 = vpop.eup %1007 }
 0x21d   : > { %v761_v51 = vadd.f32 0.5, %v760_v44  ;;  %v765_v48 = vmul.f32 0.5, %v1008_v47 }
 0x21e   : > { %v768_v52 = vmul.f32 %v1006_v43, %v757_v45 }
 0x21f   : > { %v767_v53 = vmul.f32 %v761_v51, %v465_v50  ;;  %v766_v49 = vadd.f32 0.5, %v765_v48 }
 0x221   : > { %v769_v46 = vadd.f32 %v768_v52, %v767_v53 }
 0x223   : > { %1009 = vtanh.f32 %v769_v46  ;;  %773 = vst [vmem:[#allocation5] sm:$0xff] %v769_v46 }
 0x22a   :  { %461 = sbr.rel (!%p459_p0) target bundleno = 277 (0x115), region = 69 }
 0x22d   : > { %v1010_v54 = vpop.eup %1009 }
 0x22e   : > { %v771_v55 = vmul.f32 %v1010_v54, %v766_v49 }
 0x230   : > { %772 = vst [vmem:[#allocation3] sm:$0xff] %v771_v55  ;;  %775 = vst [vmem:[%s774_s30] sm:$0xff] %v771_v55 }
 0x231   :  { %1022 = shalt.err (!%p1019_p5)
}
 0x232   :  { %s1023_s3 = scalar_lea.hbm %s1424_s7, 128 }
 0x233   :  { %p1024_p6 = scmp.ne.s32.totalorder %s1424_s7, %s1023_s3  ;;  %p1027_p7 = scmp.lt.u32.totalorder %s1023_s3, %s1424_s7 }
 0x235   :  { %p1029_p8 = pnand %p1027_p7, %p1024_p6 }
 0x237   :  { %1032 = shalt.err (!%p1029_p8)
}
 0x238   :  { %787 = dma.vmem_to_hbm [thread:$0]  %s785_s10, 128, %s1424_s7, [#allocation4]  }
 0x239   :  { %s1033_s17 = scalar_lea.vmem %s795_s12, 128  ;;  %p1038_p10 = scmp.lt.s32.totalorder %s795_s12, %s795_s12 }
 0x23a   :  { %p1034_p9 = scmp.ne.s32.totalorder %s795_s12, %s1033_s17  ;;  %p1039_p11 = scmp.lt.s32.totalorder %s1033_s17, %s1033_s17 }
 0x23c   :  { %p1040_p12 = por %p1039_p11, %p1038_p10 }
 0x23e   :  { %p1041_p13 = pnand %p1040_p12, %p1034_p9 }
 0x240   :  { %1044 = shalt.err (!%p1041_p13)
}
 0x241   :  { %s1045_s20 = scalar_lea.hbm %s1425_s8, 128 }
 0x242   :  { %p1046_p0 = scmp.ne.s32.totalorder %s1425_s8, %s1045_s20  ;;  %p1049_p1 = scmp.lt.u32.totalorder %s1045_s20, %s1425_s8 }
 0x244   :  { %p1051_p2 = pnand %p1049_p1, %p1046_p0 }
 0x246   :  { %1054 = shalt.err (!%p1051_p2)
}
 0x247   :  { %797 = dma.vmem_to_hbm [thread:$0]  %s795_s12, 128, %s1425_s8, [#allocation6]  }
 0x248   :  { %1059 = dma.done.wait [#allocation4], 128  }
 0x249   :  { %1060 = vsyncadd [#allocation4], 4294967168 }
 0x24a   :  { %1061 = dma.done.wait [#allocation6], 128  }
 0x24b   :  { %1062 = vsyncadd [#allocation6], 4294967168 }
 0x24c   :  { %806 = vsyncpa [#allocation4], 1 }
 0x24d   :  { %807 = vsyncpa [#allocation6], 1 }

</bundles_post_ra>
